<compile_context>
chip_gen: v7x
topology: tpu7x:2x2x1
jax: 0.10.0
libtpu: 0.0.40
codegen_flags: <defaults>
</compile_context>

<pallas_src>
import functools

import jax
import jax.numpy as jnp
from jax.experimental import pallas as pl
from jax.experimental.pallas import tpu as pltpu


# ----------------------------- Pallas kernel --------------------------------
def gated_conv1d_kernel(x_ref, xh_ref, lc_ref, w_ref, b_ref, o_ref, *,
                        kernel_size, stride, dilation):
    # x_ref  : (C_in, TT*stride)           main input tile (NCT, causally padded)
    # xh_ref : (C_in, HALO)                right halo of this tile, HALO % 128 == 0
    # lc_ref : (C_loc, TT)                 local-conditioning tile
    # w_ref  : (2*C_out, K*C_in + C_loc)   stacked weights [tanh ; sigmoid]
    # b_ref  : (2*C_out, 1)                per-batch fused bias (f32)
    # o_ref  : (C_out, TT)                 lane-dense output tile
    c_out, tt = o_ref.shape

    # Lane-aligned concat: both widths are multiples of 128 -> unmasked stores.
    x_full = jnp.concatenate([x_ref[...], xh_ref[...]], axis=-1)
    width = x_full.shape[-1]

    # K dilated taps: static lane rotation on the XLU, then an aligned [:, :TT]
    # slice (no wraparound contamination since off <= HALO <= width - TT*stride).
    taps = []
    for k in range(kernel_size):
        off = k * dilation
        xs = x_full if off == 0 else pltpu.roll(x_full, shift=width - off, axis=1)
        if stride == 1:
            xk = xs[:, :tt]
        else:
            # TODO(synk): stride > 1 relies on a strided lane slice; untested on Mosaic.
            xk = xs[:, :(tt - 1) * stride + 1:stride]
        # Concat is done in f32 (robust sublane concat for any channel count /
        # packed dtype), then cast back to the MXU streaming dtype in one shot.
        taps.append(xk.astype(jnp.float32))

    act = jnp.concatenate(taps + [lc_ref[...].astype(jnp.float32)], axis=0)
    act = act.astype(w_ref.dtype)                              # (K*C_in + C_loc, TT)

    # Single MXU matmul with f32 accumulation; per-batch fused bias added once.
    z = jnp.dot(w_ref[...], act, preferred_element_type=jnp.float32) + b_ref[...]

    # Gate split along sublanes (aligned when C_out % 8 == 0); fused f32 epilogue
    # written to o_ref exactly once.
    zt = z[:c_out, :]
    zs = z[c_out:, :]
    o_ref[...] = (jnp.tanh(zt) * jax.nn.sigmoid(zs)).astype(o_ref.dtype)


# ------------------------------ glue / params -------------------------------
def apply_weight_norm(v, g):
    """torch._weight_norm with dim=0: w = g * v / ||v|| (norm over all dims but 0)."""
    norm = jnp.sqrt(jnp.sum(v * v, axis=(1, 2), keepdims=True))
    return g * v / norm


def init_conv_params(key, out_ch, in_ch, ksize):
    """Deterministic init mimicking nn.Conv1d default (kaiming-uniform-ish)."""
    kw, kb = jax.random.split(key)
    fan_in = in_ch * ksize
    bound = 1.0 / jnp.sqrt(fan_in)
    w = jax.random.uniform(kw, (out_ch, in_ch, ksize), jnp.float32, -bound, bound)
    b = jax.random.uniform(kb, (out_ch,), jnp.float32, -bound, bound)
    return w, b


def make_gated_conv1d_params(
    key, in_channels, out_channels, kernel_size, local_channels, global_channels
):
    keys = jax.random.split(key, 6)
    params = {}
    for name, k, cin, ks in [
        ("tanh", keys[0], in_channels, kernel_size),
        ("sigmoid", keys[1], in_channels, kernel_size),
        ("local_tanh", keys[2], local_channels, 1),
        ("local_sigmoid", keys[3], local_channels, 1),
        ("global_tanh", keys[4], global_channels, 1),
        ("global_sigmoid", keys[5], global_channels, 1),
    ]:
        v, b = init_conv_params(k, out_channels, cin, ks)
        g = jnp.sqrt(jnp.sum(v * v, axis=(1, 2), keepdims=True))  # norm_except_dim
        params[name] = {"weight_v": v, "weight_g": g, "bias": b}
    return params


def _round_up(n, m):
    return ((n + m - 1) // m) * m


def gated_conv1d_forward(
    params,
    x,                    # (B, C_in, T)
    local_conditioning,   # (B, C_loc, T_out)
    global_conditioning,  # (B, C_glob) or (B, C_glob, 1)
    *,
    kernel_size,
    stride,
    dilation,
    is_causal,
    time_tile=2048,
    compute_dtype=jnp.bfloat16,
    out_dtype=None,       # default: x.dtype; pass bf16 to halve output writeback
):
    B, c_in, T = x.shape
    padding = (kernel_size - 1) * dilation
    pad_l = padding if is_causal else padding // 2
    t_padded = T + padding
    t_out = (t_padded - dilation * (kernel_size - 1) - 1) // stride + 1
    out_dtype = jnp.dtype(x.dtype) if out_dtype is None else jnp.dtype(out_dtype)

    # weight-norm -> effective weights
    def eff(name):
        p = params[name]
        return apply_weight_norm(p["weight_v"], p["weight_g"]), p["bias"]

    w_t, b_t = eff("tanh")
    w_s, b_s = eff("sigmoid")
    wl_t, bl_t = eff("local_tanh")
    wl_s, bl_s = eff("local_sigmoid")
    wg_t, bg_t = eff("global_tanh")
    wg_s, bg_s = eff("global_sigmoid")
    c_out = w_t.shape[0]
    c_loc = wl_t.shape[1]

    # -------- tiling: lane-dense 128-multiple output tiles, VMEM-budgeted ----
    halo = (kernel_size - 1) * dilation
    halo_pad = max(_round_up(halo, 128), 128)          # lane-aligned halo width
    tt_min = _round_up(pl.cdiv(halo_pad, stride), 128)  # keep halo within one block
    tt = min(time_tile, _round_up(t_out, 128))
    tt = max(128, (tt // 128) * 128)
    tt = max(tt, tt_min)

    act_b = jnp.dtype(compute_dtype).itemsize
    out_b = out_dtype.itemsize

    def _step_vmem_bytes(t):
        blk = t * stride
        streamed = (c_in * (blk + halo_pad) + c_loc * t) * act_b + c_out * t * out_b
        resident = 2 * c_out * (kernel_size * c_in + c_loc) * act_b + 2 * c_out * 4
        temps = (2 * c_in * (blk + halo_pad)              # x_full + one rolled tap
                 + (kernel_size * c_in + c_loc) * t       # stacked activation
                 + 3 * c_out * t) * 4                     # z + gate temporaries
        return 2 * streamed + resident + temps            # 2x: double buffering

    vmem_budget = 24 * 1024 * 1024   # conservative: fits v5e/v6e/v7x scoped VMEM
    while tt - 128 >= tt_min and _step_vmem_bytes(tt) > vmem_budget:
        tt -= 128

    # v7x has 2 TensorCores: make sure the parallel grid has >= 2 programs.
    if B == 1 and pl.cdiv(t_out, tt) == 1 and t_out > 128 and tt > tt_min:
        tt = max(tt_min, _round_up(pl.cdiv(t_out, 2), 128))

    n_t = pl.cdiv(t_out, tt)
    t_out_pad = n_t * tt
    blk_in = tt * stride
    t_in_full = (n_t + 1) * blk_in      # main tiles + room for the halo reshape

    # -------- inputs: NCT layout, single pad, slice/reshape halo (no gather) -
    # TODO(synk): the causal pad still costs one extra HBM pass over x; it could
    # be folded into the kernel with per-tile masking of the first/last blocks.
    xc = x.astype(compute_dtype)
    xp = jnp.pad(xc, ((0, 0), (0, 0), (pad_l, t_in_full - T - pad_l)))
    x_halo = xp[:, :, blk_in:].reshape(B, c_in, n_t, blk_in)[..., :halo_pad]
    x_halo = jnp.moveaxis(x_halo, 1, 2)                   # (B, n_t, C_in, HALO)

    assert local_conditioning.shape[-1] == t_out, (
        "local conditioning frames must match conv output frames")
    lc = jnp.pad(local_conditioning.astype(compute_dtype),
                 ((0, 0), (0, 0), (0, t_out_pad - t_out)))

    # -------- global conditioning folded into a per-batch stacked bias -------
    if global_conditioning.ndim == 3:
        gvec = global_conditioning[:, :, 0]
    else:
        gvec = global_conditioning
    gvec = gvec.astype(jnp.float32)
    bias_t = (b_t + bl_t + bg_t)[None, :] + gvec @ wg_t[:, :, 0].T   # (B, C_out)
    bias_s = (b_s + bl_s + bg_s)[None, :] + gvec @ wg_s[:, :, 0].T
    bias = jnp.concatenate([bias_t, bias_s], axis=1)[:, :, None]     # (B, 2*C_out, 1)
    bias = bias.astype(jnp.float32)

    # -------- stacked weight: rows [tanh ; sigmoid], cols [tap0|...|tapK-1|local]
    def stack_taps(w):   # (C_out, C_in, K) -> (C_out, K*C_in); col k*C_in+c = w[:,c,k]
        return jnp.transpose(w, (0, 2, 1)).reshape(c_out, kernel_size * c_in)

    w_stack = jnp.concatenate([
        jnp.concatenate([stack_taps(w_t), wl_t[:, :, 0]], axis=1),
        jnp.concatenate([stack_taps(w_s), wl_s[:, :, 0]], axis=1),
    ], axis=0).astype(compute_dtype)                       # (2*C_out, K*C_in+C_loc)
    c_k = kernel_size * c_in + c_loc

    kern = functools.partial(gated_conv1d_kernel, kernel_size=kernel_size,
                             stride=stride, dilation=dilation)
    cost = pl.CostEstimate(
        flops=2 * B * t_out_pad * (2 * c_out) * c_k,
        transcendentals=2 * B * c_out * t_out_pad,
        bytes_accessed=(xp.size * act_b + x_halo.size * act_b + lc.size * act_b
                        + w_stack.size * act_b + bias.size * 4
                        + B * c_out * t_out_pad * out_b),
    )

    out = pl.pallas_call(
        kern,
        out_shape=jax.ShapeDtypeStruct((B, c_out, t_out_pad), out_dtype),
        grid=(B, n_t),
        in_specs=[
            pl.BlockSpec((None, c_in, blk_in), lambda b, j: (b, 0, j)),
            pl.BlockSpec((None, None, c_in, halo_pad), lambda b, j: (b, j, 0, 0)),
            pl.BlockSpec((None, c_loc, tt), lambda b, j: (b, 0, j)),
            pl.BlockSpec((2 * c_out, c_k), lambda b, j: (0, 0)),
            pl.BlockSpec((None, 2 * c_out, 1), lambda b, j: (b, 0, 0)),
        ],
        out_specs=pl.BlockSpec((None, c_out, tt), lambda b, j: (b, 0, j)),
        compiler_params=pltpu.CompilerParams(
            dimension_semantics=("parallel", "parallel")),
        cost_estimate=cost,
    )(xp, x_halo, lc, w_stack, bias)

    # Output is already in (B, C_out, T) layout; drop the tile padding (the padded
    # columns hold tanh(bias)*sigmoid(bias), not zeros, so the slice is required).
    return out[:, :, :t_out]


# ------------------------------ pure-JAX ref ---------------------------------
def conv1d_ref(x, w, b, stride, dilation):
    y = jax.lax.conv_general_dilated(
        x, w, window_strides=(stride,), padding="VALID",
        rhs_dilation=(dilation,), dimension_numbers=("NCH", "OIH", "NCH"))
    return y + b[None, :, None]


def gated_conv1d_ref(params, x, lc, gc, *, kernel_size, stride, dilation, is_causal):
    padding = (kernel_size - 1) * dilation
    pad_l, pad_r = (padding, 0) if is_causal else (padding // 2, padding - padding // 2)
    xp = jnp.pad(x, ((0, 0), (0, 0), (pad_l, pad_r)))

    def eff(name):
        p = params[name]
        return apply_weight_norm(p["weight_v"], p["weight_g"]), p["bias"]

    w_t, b_t = eff("tanh"); w_s, b_s = eff("sigmoid")
    wl_t, bl_t = eff("local_tanh"); wl_s, bl_s = eff("local_sigmoid")
    wg_t, bg_t = eff("global_tanh"); wg_s, bg_s = eff("global_sigmoid")

    x_tanh = conv1d_ref(xp, w_t, b_t, stride, dilation)
    x_sigm = conv1d_ref(xp, w_s, b_s, stride, dilation)
    x_tanh = x_tanh + conv1d_ref(lc, wl_t, bl_t, 1, 1)
    x_sigm = x_sigm + conv1d_ref(lc, wl_s, bl_s, 1, 1)
    gc3 = gc if gc.ndim == 3 else gc[:, :, None]
    x_tanh = x_tanh + conv1d_ref(gc3, wg_t, bg_t, 1, 1)
    x_sigm = x_sigm + conv1d_ref(gc3, wg_s, bg_s, 1, 1)
    return jnp.tanh(x_tanh) * jax.nn.sigmoid(x_sigm)


# ---------------------------------- main -------------------------------------
if __name__ == "__main__":
    def run_case(case_key, *, B, C_IN, C_OUT, T, KSIZE, STRIDE, DILATION, C_LOC,
                 C_GLOB, IS_CAUSAL, compute_dtype, out_dtype, time_tile, atol):
        kp, kx, kl, kg = jax.random.split(case_key, 4)
        params = make_gated_conv1d_params(kp, C_IN, C_OUT, KSIZE, C_LOC, C_GLOB)
        x = jax.random.normal(kx, (B, C_IN, T), jnp.float32)
        padding = (KSIZE - 1) * DILATION
        t_out = (T + padding - DILATION * (KSIZE - 1) - 1) // STRIDE + 1
        lc = jax.random.normal(kl, (B, C_LOC, t_out), jnp.float32)
        gc = jax.random.normal(kg, (B, C_GLOB), jnp.float32)
        common = dict(kernel_size=KSIZE, stride=STRIDE, dilation=DILATION,
                      is_causal=IS_CAUSAL)

        ref = jax.block_until_ready(gated_conv1d_ref(params, x, lc, gc, **common))
        fwd = jax.jit(functools.partial(
            gated_conv1d_forward, compute_dtype=compute_dtype, out_dtype=out_dtype,
            time_tile=time_tile, **common))
        out = jax.block_until_ready(fwd(params, x, lc, gc))
        assert out.shape == ref.shape, (out.shape, ref.shape)
        err = float(jnp.max(jnp.abs(out.astype(jnp.float32) - ref)))
        assert err <= atol, f"max abs error {err} > {atol}"
        return err

    key = jax.random.PRNGKey(0)
    keys = jax.random.split(key, 4)

    # Module config: GatedConv1d(in=4, out=8, kernel_size=3, stride=1, dilation=2,
    #                            bias=True, is_causal=True, local_channels=3,
    #                            global_channels=5, weight_norm=True)
    base = dict(B=2, C_IN=4, C_OUT=8, T=16, KSIZE=3, STRIDE=1, DILATION=2,
                C_LOC=3, C_GLOB=5, IS_CAUSAL=True)

    # f32 path: tight numerical check of the fused single-matmul kernel.
    run_case(keys[0], **base, compute_dtype=jnp.float32, out_dtype=jnp.float32,
             time_tile=2048, atol=1e-5)
    # bf16 streams + bf16 output (halved writeback); f32 accumulation/epilogue.
    run_case(keys[1], **base, compute_dtype=jnp.bfloat16, out_dtype=jnp.bfloat16,
             time_tile=2048, atol=2e-2)
    # Multi-tile path (n_t > 1) to exercise halo handling across tile boundaries.
    multi = dict(base, B=1, T=300)
    run_case(keys[2], **multi, compute_dtype=jnp.float32, out_dtype=jnp.float32,
             time_tile=128, atol=1e-5)
    # Non-causal, even kernel (asymmetric left/right padding) sanity check.
    noncausal = dict(base, KSIZE=4, DILATION=1, IS_CAUSAL=False)
    run_case(keys[3], **noncausal, compute_dtype=jnp.float32, out_dtype=jnp.float32,
             time_tile=2048, atol=1e-5)

    print("KERNEL_OK")
</pallas_src>

<mosaic_0001>
module attributes {stable_mosaic.version = 11 : i64} {
  func.func @gated_conv1d_kernel(%arg0: i32, %arg1: i32, %arg2: memref<1x4x128xf32, #tpu.memory_space<vmem>>, %arg3: memref<1x1x4x128xf32, #tpu.memory_space<vmem>>, %arg4: memref<1x3x128xf32, #tpu.memory_space<vmem>>, %arg5: memref<16x15xf32, #tpu.memory_space<vmem>>, %arg6: memref<1x16x1xf32, #tpu.memory_space<vmem>>, %arg7: memref<1x8x128xf32, #tpu.memory_space<vmem>>) attributes {dimension_semantics = [#tpu.dimension_semantics<parallel>, #tpu.dimension_semantics<parallel>], iteration_bounds = array<i64: 2, 1>, scalar_prefetch = 0 : i64, scratch_operands = 0 : i64, tpu.core_type = #tpu.core_type<tc>, window_params = [{transform_indices = @transform_0, window_bounds = array<i64: 1, 4, 128>}, {transform_indices = @transform_1, window_bounds = array<i64: 1, 1, 4, 128>}, {transform_indices = @transform_2, window_bounds = array<i64: 1, 3, 128>}, {pipeline_mode = #tpu.pipeline_mode<synchronous>, transform_indices = @transform_3, window_bounds = array<i64: 16, 15>}, {transform_indices = @transform_4, window_bounds = array<i64: 1, 16, 1>}, {transform_indices = @transform_5, window_bounds = array<i64: 1, 8, 128>}]} {
    %c0 = arith.constant 0 : index
    %c0_0 = arith.constant 0 : index
    %c0_1 = arith.constant 0 : index
    %0 = vector.load %arg2[%c0, %c0_0, %c0_1] : memref<1x4x128xf32, #tpu.memory_space<vmem>>, vector<1x4x128xf32>
    %1 = vector.shape_cast %0 : vector<1x4x128xf32> to vector<4x128xf32>
    %c0_2 = arith.constant 0 : index
    %c0_3 = arith.constant 0 : index
    %c0_4 = arith.constant 0 : index
    %c0_5 = arith.constant 0 : index
    %2 = vector.load %arg3[%c0_2, %c0_3, %c0_4, %c0_5] : memref<1x1x4x128xf32, #tpu.memory_space<vmem>>, vector<1x1x4x128xf32>
    %3 = vector.shape_cast %2 : vector<1x1x4x128xf32> to vector<4x128xf32>
    %4 = tpu.concatenate %1, %3 in 1 : vector<4x128xf32>, vector<4x128xf32> -> vector<4x256xf32>
    %5 = vector.extract_strided_slice %4 {offsets = [0, 0], sizes = [4, 128], strides = [1, 1]} : vector<4x256xf32> to vector<4x128xf32>
    %c254_i32 = arith.constant 254 : i32
    %6 = tpu.dynamic_rotate %4 by %c254_i32 dim 1 : vector<4x256xf32>, i32 -> vector<4x256xf32>
    %7 = vector.extract_strided_slice %6 {offsets = [0, 0], sizes = [4, 128], strides = [1, 1]} : vector<4x256xf32> to vector<4x128xf32>
    %c252_i32 = arith.constant 252 : i32
    %8 = tpu.dynamic_rotate %4 by %c252_i32 dim 1 : vector<4x256xf32>, i32 -> vector<4x256xf32>
    %9 = vector.extract_strided_slice %8 {offsets = [0, 0], sizes = [4, 128], strides = [1, 1]} : vector<4x256xf32> to vector<4x128xf32>
    %c0_6 = arith.constant 0 : index
    %c0_7 = arith.constant 0 : index
    %c0_8 = arith.constant 0 : index
    %10 = vector.load %arg4[%c0_6, %c0_7, %c0_8] : memref<1x3x128xf32, #tpu.memory_space<vmem>>, vector<1x3x128xf32>
    %11 = vector.shape_cast %10 : vector<1x3x128xf32> to vector<3x128xf32>
    %12 = tpu.concatenate %5, %7, %9, %11 in 0 : vector<4x128xf32>, vector<4x128xf32>, vector<4x128xf32>, vector<3x128xf32> -> vector<15x128xf32>
    %c0_9 = arith.constant 0 : index
    %c0_10 = arith.constant 0 : index
    %13 = vector.load %arg5[%c0_9, %c0_10] : memref<16x15xf32, #tpu.memory_space<vmem>>, vector<16x15xf32>
    %cst = arith.constant dense<0.000000e+00> : vector<16x128xf32>
    %14 = tpu.matmul %13, %12, %cst {dimension_numbers = #tpu.dot_dimension_numbers<[1], [0], [0], [1], [0, 0, 1, 1], [], []>} : vector<16x15xf32>, vector<15x128xf32>, vector<16x128xf32> -> vector<16x128xf32>
    %c0_11 = arith.constant 0 : index
    %c0_12 = arith.constant 0 : index
    %c0_13 = arith.constant 0 : index
    %15 = vector.load %arg6[%c0_11, %c0_12, %c0_13] : memref<1x16x1xf32, #tpu.memory_space<vmem>>, vector<1x16x1xf32>
    %16 = vector.shape_cast %15 : vector<1x16x1xf32> to vector<16x1xf32>
    %17 = vector.broadcast %16 : vector<16x1xf32> to vector<16x128xf32>
    %18 = arith.addf %14, %17 : vector<16x128xf32>
    %19 = vector.extract_strided_slice %18 {offsets = [0, 0], sizes = [8, 128], strides = [1, 1]} : vector<16x128xf32> to vector<8x128xf32>
    %20 = vector.extract_strided_slice %18 {offsets = [8, 0], sizes = [8, 128], strides = [1, 1]} : vector<16x128xf32> to vector<8x128xf32>
    %21 = math.tanh %19 : vector<8x128xf32>
    %22 = arith.negf %20 : vector<8x128xf32>
    %23 = math.exp %22 : vector<8x128xf32>
    %cst_14 = arith.constant 1.000000e+00 : f32
    %24 = vector.broadcast %cst_14 : f32 to vector<8x128xf32>
    %25 = arith.addf %24, %23 : vector<8x128xf32>
    %26 = arith.divf %24, %25 : vector<8x128xf32>
    %27 = arith.mulf %21, %26 : vector<8x128xf32>
    %c0_15 = arith.constant 0 : index
    %c0_16 = arith.constant 0 : index
    %c0_17 = arith.constant 0 : index
    %28 = vector.load %arg7[%c0_15, %c0_16, %c0_17] : memref<1x8x128xf32, #tpu.memory_space<vmem>>, vector<1x8x128xf32>
    %29 = vector.shape_cast %28 : vector<1x8x128xf32> to vector<8x128xf32>
    %30 = vector.shape_cast %27 : vector<8x128xf32> to vector<1x8x128xf32>
    tpu.vector_store %arg7[%c0_15, %c0_16, %c0_17], %30 {strides = array<i32>} : memref<1x8x128xf32, #tpu.memory_space<vmem>>, vector<1x8x128xf32>,
    return
  }
  func.func @transform_0(%arg0: i32, %arg1: i32) -> (i32, i32, i32) {
    %c0_i32 = arith.constant 0 : i32
    %c0_i32_0 = arith.constant 0 : i32
    return %arg0, %c0_i32, %arg1 : i32, i32, i32
  }
  func.func @transform_1(%arg0: i32, %arg1: i32) -> (i32, i32, i32, i32) {
    %c0_i32 = arith.constant 0 : i32
    %c0_i32_0 = arith.constant 0 : i32
    %c0_i32_1 = arith.constant 0 : i32
    return %arg0, %arg1, %c0_i32, %c0_i32_0 : i32, i32, i32, i32
  }
  func.func @transform_2(%arg0: i32, %arg1: i32) -> (i32, i32, i32) {
    %c0_i32 = arith.constant 0 : i32
    %c0_i32_0 = arith.constant 0 : i32
    return %arg0, %c0_i32, %arg1 : i32, i32, i32
  }
  func.func @transform_3(%arg0: i32, %arg1: i32) -> (i32, i32) {
    %c0_i32 = arith.constant 0 : i32
    %c0_i32_0 = arith.constant 0 : i32
    %c0_i32_1 = arith.constant 0 : i32
    return %c0_i32, %c0_i32_0 : i32, i32
  }
  func.func @transform_4(%arg0: i32, %arg1: i32) -> (i32, i32, i32) {
    %c0_i32 = arith.constant 0 : i32
    %c0_i32_0 = arith.constant 0 : i32
    %c0_i32_1 = arith.constant 0 : i32
    return %arg0, %c0_i32, %c0_i32_0 : i32, i32, i32
  }
  func.func @transform_5(%arg0: i32, %arg1: i32) -> (i32, i32, i32) {
    %c0_i32 = arith.constant 0 : i32
    %c0_i32_0 = arith.constant 0 : i32
    return %arg0, %c0_i32, %arg1 : i32, i32, i32
  }
}

</mosaic_0001>

<bundles_post_ra>
// kernel: gated_conv1d_forward.1
= control target key start
LH: loop header
LB: loop body
LE: loop exit
PB: predicated region body
PF: predicated region fallthrough
CT: control target
= control target key end

     0   :  { %10 = vsyncpa [#allocation3], 0  ;;  %s950_s0 = inlined_call_operand.vmem [shape: f32[2,4,256], index: 0, kind: input, shape index: {}]   ;;  %s951_s1 = inlined_call_operand.vmem [shape: f32[2,1,4,128], index: 1, kind: input, shape index: {}]   ;;  %s952_s2 = inlined_call_operand.vmem [shape: f32[2,3,128], index: 2, kind: input, shape index: {}]   ;;  %s953_s3 = inlined_call_operand.vmem [shape: f32[16,15], index: 3, kind: input, shape index: {}]   ;;  %s954_s4 = inlined_call_operand.vmem [shape: f32[2,16,1], index: 4, kind: input, shape index: {}]   ;;  %s955_s5 = inlined_call_operand.hbm [shape: f32[2,8,128], index: 5, kind: output, shape index: {}]  }
   0x1   :  { %12 = vsyncpa [#allocation3 + $0x1], 0  ;;  %s821_s18 = smov 0   ;;  %s823_s19 = smov 0  }
   0x2   :  { %s825_s20 = smov 0   ;;  %s827_s21 = smov 0  }
   0x3   :  { %s829_s22 = smov 0   ;;  %s831_s23 = smov 0  }
   0x4 LB: > { %s590_s24 = sadd.s32 4294967295, %s784_s23   ;;  %s591_s25 = sadd.s32 4294967294, %s784_s23   ;;  %s784_s23 = sphi %s831_s23, %s18_s23   ;;  %s780_s22 = sphi %s829_s22, %s962_s22   ;;  %s776_s21 = sphi %s827_s21, %s961_s21   ;;  %s772_s20 = sphi %s825_s20, %s960_s20   ;;  %s768_s19 = sphi %s823_s19, %s959_s19   ;;  %s764_s18 = sphi %s821_s18, %s958_s18  }
   0x5   : > { %s30_s26 = sadd.s32 1, %s780_s22  ;;  %s170_s27 = sadd.s32 1, %s772_s20 }
   0x6   : > { %p32_p0 = scmp.ge.s32.totalorder %s30_s26, 2  ;;  %p180_p1 = scmp.ne.s32.totalorder %s772_s20, %s768_s19 }
   0x7   : > { %p181_p2 = scmp.eq.s32.totalorder %s590_s24, 1  ;;  %p186_p3 = scmp.ne.s32.totalorder %s768_s19, %s764_s18 }
   0x8   : > { %s964_s26 = smov (%p32_p0, %s30_s26), 0  ;;  %p187_p5 = scmp.eq.s32.totalorder %s591_s25, 1 }
   0x9   : > { %p861_p4 = por %p181_p2, %p180_p1  ;;  %s165_s29 = ssub.s32 %s780_s22, %s964_s26 }
   0xa   : > { %p594_p6 = scmp.ge.s32.totalorder %s784_s23, 1  ;;  %p168_p7 = scmp.eq.s32.totalorder %s165_s29, 0 }
   0xb   : > { %p868_p8 = por %p187_p5, %p186_p3  ;;  %p247_p9 = scmp.lt.s32.totalorder %s784_s23, 3 }
   0xc   : > { %s874_s6 = scalar_select %p168_p7, %s772_s20, %s170_s27  }
   0xd   : > { %p248_p10 = pnand %p594_p6, %p247_p9 }
   0xe   : > { %p297_p11 = scmp.lt.s32.totalorder (!%p248_p10), %s776_s21, 1  ;;  %v350_v3 = vld [vmem:[%s953_s3] sm:$0xff] (!%p248_p10)  ;;  %vm364_vm0 = vcmask (!%p248_p10), 121856   ;;  %s786_s24 = smov (!%p248_p10), 126   ;;  %v787_v4 = vmov (!%p248_p10), 0   ;;  %v330_v7 = vlaneseq (!%p248_p10)  ;;  %vm347_vm3 = vcmask (!%p248_p10), 1043456  }
   0xf   : > { %251 = sbr.rel (%p248_p10) target bundleno = 415 (0x19f), region = 40  ;;  %620 = vmatprep.mubr.msk.f32.mxu0 (!%p248_p10), %vm364_vm0, %v350_v3  ;;  %698 = vset.pattern.permute.xlu1 (!%p248_p10), %v787_v4  ;;  %s788_s10 = smov (!%p248_p10), 124   ;;  %vm371_vm4 = vcmask (!%p248_p10), 1046528   ;;  %vm789_vm5 = vmmov (!%p248_p10), 1   ;;  %v351_v23 = vld [vmem:[%s953_s3 + $0x8] sm:$0xff] (!%p248_p10) }
  0x10   : > { %699 = vset.pattern.permute.xlu0 (!%p248_p10), %v787_v4  ;;  %v331_v8 = vand.u32 (!%p248_p10), 127, %v330_v7  ;;  %vm624_vm6 = vmpackc.low (!%p248_p10), %vm371_vm4, %vm789_vm5  ;;  %s294_s14 = sand.u32 (!%p248_p10), 1, %s768_s19   ;;  %s607_s16 = sshll.u32 (!%p248_p10), %s776_s21, 7 }
  0x11   : > { %s903_s29 = scalar_lea.hbm (!%p248_p10), %s955_s5, %s607_s16 }
  0x12   : > { %vm332_vm1 = vcmp.lt.s32.totalorder (!%p248_p10), %v331_v8, 126  ;;  %vm338_vm2 = vcmp.lt.s32.totalorder (!%p248_p10), %v331_v8, 124 }
  0x16   : > { %s298_s7 = scalar_select %p297_p11, %s776_s21, 1 }
  0x17   : > { %s790_s21 = smov [#allocation2]  }
  0x18   : > { %s610_s8 = sshll.u32 %s298_s7, 3  ;;  %s598_s9 = sshll.u32 %s298_s7, 2 }
  0x19   : > { %s304_s12 = scalar_lea.vmem %s950_s0, %s610_s8  ;;  %s311_s15 = scalar_lea.vmem %s951_s1, %s598_s9 }
  0x1a   : > { %v324_v0 = vld [vmem:[%s304_s12] sm:$0xf]  ;;  %s611_s25 = sshll.u32 %s298_s7, 4  ;;  %s318_s13 = scalar_lea.vmem %s952_s2, %s598_s9 }
  0x1b   : > { %v325_v1 = vld [vmem:[%s311_s15] sm:$0xf]  ;;  %s323_s8 = scalar_lea.vmem %s954_s4, %s611_s25  ;;  %s595_s15 = sshll.u32 %s294_s14, 3 }
  0x1c   : > { %v688_v2 = vpack.i.bf16 %v325_v1, %v324_v0  ;;  %v353_v5 = vld [vmem:[%s323_s8 + $0x8] sm:$0xff]  ;;  %v352_v6 = vld [vmem:[%s323_s8] sm:$0xff]  ;;  %s296_s17 = scalar_lea.vmem [#allocation2], %s595_s15  ;;  %s460_s8 = scalar_lea.sflag [#allocation3], %s294_s14 }
  0x1d   : > { %361 = vperm.xlu1 %698, %v353_v5   ;;  %v340_v10 = vld [vmem:[%s318_s13] sm:$0x7]  ;;  %s710_s11 = sshll.u32 %s790_s21, 4  ;;  %s711_s11 = int_to_ptr.vmem [resolvable:$false] %s710_s11 }
  0x1e   : > { %689 = vrot.lane.b32.xlu0 %v688_v2, %s786_s24  ;;  %v345_v14 = vrot.slane %v340_v10, 4  ;;  %s474_s24 = sshll.u32 %s296_s17, 4  ;;  %s712_s12 = scalar_lea.vmem %s711_s11, 256  ;;  %s905_s24 = int_to_ptr.vmem [resolvable:$true] %s474_s24 }
  0x1f   : > { %p713_p1 = scmp.lt.s32.totalorder %s905_s24, %s711_s11 }
  0x21   : > { %356 = vperm.xlu1 %698, %v352_v6  }
  0x22   : > { %694 = vrot.lane.b32.xlu0 %v688_v2, %s788_s10  ;;  %s706_s10 = scalar_lea.vmem %s905_s24, 128 }
  0x23   : > { %p707_p12 = scmp.ne.s32.totalorder %s905_s24, %s706_s10  ;;  %p714_p2 = scmp.lt.s32.totalorder %s712_s12, %s706_s10 }
  0x25   : > { %p708_p13 = pnand %p707_p12, %p861_p4  ;;  %p715_p3 = por %p714_p2, %p713_p1 }
  0x27   : > { %p709_p0 = pneg %p708_p13 }
  0x29   : > { %p716_p5 = pnand %p715_p3, %p709_p0 }
  0x90   : > { %v690_v9 = vpop.permute.xlu0 %689 }
  0x91   : > { %v692_v11 = vunpack.i.h.bf16 %v690_v9  ;;  %v691_v12 = vunpack.i.l.bf16 %v690_v9 }
  0x93   : > { %v333_v13 = vsel %vm332_vm1, %v691_v12, %v692_v11 }
  0x94   : > { %v342_v15 = vrot.slane %v333_v13, 4  ;;  %v695_v16 = vpop.permute.xlu0 %694 }
  0x95   : > { %v697_v17 = vunpack.i.h.bf16 %v695_v16  ;;  %v696_v18 = vunpack.i.l.bf16 %v695_v16 }
  0x96   : > { %v348_v20 = vsel %vm347_vm3, %v324_v0, %v342_v15 }
  0x97   : > { %v339_v19 = vsel %vm338_vm2, %v696_v18, %v697_v17 }
  0x98   : > { %v349_v21 = vsel %vm347_vm3, %v339_v19, %v345_v14 }
  0x99   : > { %v623_v22 = vpack.c.bf16 %v349_v21, %v348_v20 }
  0x9b   : > { %625 = vmatprep.subr.msk.bf16.mxu0 %vm624_vm6, %v623_v22 }
  0x9c   : > { %628 = vmatpush3.bf16.msk.msra.mxu0 %vm624_vm6, %v623_v22  ;;  %v362_v24 = vpop.permute.xlu1 %361 }
  0x9f   : > { %621 = vmatmul.mubr.msk.f32.vlgmr.msra.gmra.mrb[0].mxu0 %vm364_vm0, %v351_v23 }
  0xa0   : > { %v357_v29 = vpop.permute.xlu1 %356 }
 0x172   : > { %v622_v25 = vpop.f32.mrb[0].mxu0 }
 0x173   : > { %v447_v26 = vadd.f32 %v622_v25, %v362_v24  ;;  %v441_v27 = vpop.f32.mrb[1].mxu0 }
 0x174   : > { %v442_v30 = vadd.f32 %v441_v27, %v357_v29 }
 0x175   : > { %v605_v28 = vmul.f32 -1.442695, %v447_v26 }
 0x177   : > { %700 = vpow2.f32 %v605_v28 }
 0x178   : > { %702 = vtanh.f32 %v442_v30 }
 0x181   : > { %v701_v31 = vpop.eup %700 }
 0x182   : > { %v454_v32 = vadd.f32 1.0, %v701_v31  ;;  %v703_v33 = vpop.eup %702 }
 0x184   : > { %704 = vrcp.f32 %v454_v32 }
 0x18e   : > { %v705_v34 = vpop.eup %704 }
 0x18f   : > { %v457_v35 = vmul.f32 %v705_v34, %v703_v33 }
 0x191   : > { %458 = vst [vmem:[%s296_s17] sm:$0xff] %v457_v35 }
 0x192   : > { %719 = shalt.err (!%p716_p5)
}
 0x193   : > { %s720_s13 = scalar_lea.hbm %s903_s29, 128  ;;  %s724_s14 = scalar_lea.hbm %s955_s5, 256 }
 0x194   : > { %p721_p6 = scmp.ne.s32.totalorder %s903_s29, %s720_s13  ;;  %p725_p10 = scmp.lt.u32.totalorder %s903_s29, %s955_s5 }
 0x195   : > { %p726_p11 = scmp.lt.u32.totalorder %s724_s14, %s720_s13  ;;  %p728_p13 = scmp.lt.u32.totalorder %s720_s13, %s903_s29 }
 0x196   : > { %p722_p7 = pnand %p721_p6, %p861_p4 }
 0x197   : > { %p727_p12 = por %p726_p11, %p725_p10 }
 0x198   : > { %p723_p9 = pneg %p722_p7 }
 0x199   : > { %p729_p0 = por %p728_p13, %p727_p12 }
 0x19b   : > { %p730_p1 = pnand %p729_p0, %p723_p9 }
 0x19d   : > { %733 = shalt.err (!%p730_p1)
}
 0x19e   : > { %629 = dma.vmem_to_hbm [thread:$0]  (%p861_p4), %s905_s24, 128, %s903_s29, %s460_s8  }
 0x19f PF: > { %p635_p2 = scmp.ge.s32.totalorder %s784_s23, 2  ;;  %s486_s17 = sand.u32 1, %s764_s18  }
 0x1a0   : > { %s487_s25 = scalar_lea.sflag [#allocation3], %s486_s17 }
 0x1a1   : > { %p632_p3 = pnand %p635_p2, %p868_p8 }
 0x1a3   : > { %759 = dma.done.wait (!%p632_p3), %s487_s25, 128  }
 0x1a4   : > { %761 = vsyncadd (!%p632_p3), %s487_s25, 4294967168  ;;  %s18_s23 = sadd.s32 1, %s784_s23   ;;  %s958_s18 = smov %s768_s19 }
 0x1a5   : > { %p15_p5 = scmp.ge.s32.totalorder %s18_s23, 4   ;;  %s959_s19 = smov %s772_s20 }
 0x1a6   : > { %s960_s20 = smov %s874_s6  ;;  %s961_s21 = smov %s780_s22 }
 0x1a7   : > { %s962_s22 = smov %s964_s26  ;;  %17 = sbr.rel (!%p15_p5) target bundleno = 4 (0x4), region = 84 }
 0x1ae   :  { %492 = vsyncpa [#allocation3], 1 }
 0x1af   :  { %494 = vsyncpa [#allocation3 + $0x1], 1 }

</bundles_post_ra>
